<compile_context>
chip_gen: v5e
topology: v5e:2x2
jax: 0.10.0
libtpu: 0.0.40
codegen_flags: <defaults>
</compile_context>

<pallas_src>
import functools
import math

import jax
import jax.numpy as jnp
from jax import lax
from jax.experimental import pallas as pl
from jax.experimental.pallas import tpu as pltpu


_PARAM_ORDER = ('wq', 'bq', 'wk', 'bk', 'wv', 'bv', 'wo', 'bo',
                'g1', 'be1', 'g2', 'be2', 'w1', 'bf1', 'w2', 'bf2')
_MATMUL_WEIGHTS = frozenset({'wq', 'wk', 'wv', 'wo', 'w1', 'w2'})


def _layernorm(x, g, b, eps=1e-6):
    # Matches bert_modules.utils.LayerNorm: unbiased std and (std + eps).
    mean = jnp.mean(x, axis=-1, keepdims=True)
    diff = x - mean
    var = jnp.sum(diff * diff, axis=-1, keepdims=True) / (x.shape[-1] - 1)
    inv = pl.reciprocal(jnp.sqrt(var) + eps, approx=True)   # EUP slot, not VALU
    return g * diff * inv + b


def _gelu(x):
    # BERT4Rec custom GELU (tanh approximation).
    return 0.5 * x * (1.0 + jnp.tanh(
        math.sqrt(2.0 / math.pi) * (x + 0.044715 * x * x * x)))


# ----------------------- per-(batch-tile, layer) kernel -----------------------

def _bert_layer_kernel(tok_ref, pos_ref,
                       wq_ref, bq_ref, wk_ref, bk_ref, wv_ref, bv_ref,
                       wo_ref, bo_ref, g1_ref, be1_ref, g2_ref, be2_ref,
                       w1_ref, bf1_ref, w2_ref, bf2_ref,
                       o_ref, ctx_ref, *, num_heads, batch_tile, seq_len):
    L = seq_len
    bt = batch_tile
    rows, H = o_ref.shape
    dk = H // num_heads
    scale = 1.0 / math.sqrt(dk)
    layer = pl.program_id(1)

    # ---- layer 0 only: token + positional embedding, then padding mask -------
    @pl.when(layer == 0)
    def _():
        pos = pos_ref[...]                                         # (L, H)
        if bt == 1:
            x0 = tok_ref[...] + pos                                # plain broadcast add
        else:
            pos_b = lax.broadcast_in_dim(pos, (bt, L, H), (1, 2)).reshape(rows, H)
            x0 = tok_ref[...] + pos_b
        rid = lax.broadcasted_iota(jnp.int32, (rows, 1), 0)
        x0 = jnp.where(rid % L == L - 1, 0.0, x0)                  # masked_fill last pos
        o_ref[...] = x0

    # Activation carry: x lives in the revisited output block (VMEM) across the
    # whole layer axis; HBM writeback only happens when the batch tile changes.
    x = o_ref[...]

    wq, wk, wv, wo = wq_ref[0], wk_ref[0], wv_ref[0], wo_ref[0]     # bf16
    w1, w2 = w1_ref[0], w2_ref[0]                                   # bf16
    bq, bk, bv, bo = bq_ref[0], bk_ref[0], bv_ref[0], bo_ref[0]     # f32
    bf1, bf2 = bf1_ref[0], bf2_ref[0]
    g1, be1, g2, be2 = g1_ref[0], be1_ref[0], g2_ref[0], be2_ref[0]

    # -- sublayer 1: x + MultiHeadedAttention(LayerNorm(x)) --
    h = _layernorm(x, g1, be1).astype(jnp.bfloat16)
    q = (jnp.dot(h, wq, preferred_element_type=jnp.float32) + bq) * scale  # scale hoisted
    k = jnp.dot(h, wk, preferred_element_type=jnp.float32) + bk
    v = jnp.dot(h, wv, preferred_element_type=jnp.float32) + bv

    if bt > 1:
        # Block-diagonal additive mask so attention never mixes batch elements.
        rid = lax.broadcasted_iota(jnp.int32, (rows, rows), 0) // L
        cid = lax.broadcasted_iota(jnp.int32, (rows, rows), 1) // L
        cross = jnp.where(rid == cid, 0.0, -1e9)
    # TODO(synk): the reference forward calls transformer.forward(x) without a
    # mask, so no attention-score masking is applied here (eval path).

    for hh in range(num_heads):                  # static loop, NH is small
        c0 = hh * dk
        qh = q[:, c0:c0 + dk].astype(jnp.bfloat16)
        kh = k[:, c0:c0 + dk].astype(jnp.bfloat16)
        vh = v[:, c0:c0 + dk].astype(jnp.bfloat16)
        s = lax.dot_general(qh, kh, (((1,), (1,)), ((), ())),
                            preferred_element_type=jnp.float32)     # (rows, rows)
        if bt > 1:
            s = s + cross
        s = s - jnp.max(s, axis=-1, keepdims=True)
        p = jnp.exp(s)
        p = p * pl.reciprocal(jnp.sum(p, axis=-1, keepdims=True), approx=True)
        # Pack the head context straight into VMEM scratch at a static offset
        # (no python-list / concatenate packing).
        ctx_ref[:, c0:c0 + dk] = jnp.dot(p.astype(jnp.bfloat16), vh,
                                         preferred_element_type=jnp.float32)

    attn = jnp.dot(ctx_ref[...].astype(jnp.bfloat16), wo,
                   preferred_element_type=jnp.float32) + bo
    x = x + attn

    # -- sublayer 2: x + PositionwiseFeedForward(LayerNorm(x)) --
    h2 = _layernorm(x, g2, be2).astype(jnp.bfloat16)
    f = _gelu(jnp.dot(h2, w1, preferred_element_type=jnp.float32) + bf1)
    f = jnp.dot(f.astype(jnp.bfloat16), w2, preferred_element_type=jnp.float32) + bf2
    o_ref[...] = x + f


# ----------------------- wrappers -----------------------

def bert_forward(token_ids, tok_table, pos_table, blocks, num_heads, *, batch_tile=1):
    """Eval path (train=False). Returns (x, raw_mask) like the torch module."""
    B, L = token_ids.shape
    H = tok_table.shape[1]
    num_layers = len(blocks)
    assert B % batch_tile == 0
    rows = batch_tile * L

    raw_mask = jnp.ones_like(token_ids)
    raw_mask = raw_mask.at[:, -1].set(0)

    # Glue: embedding-table gather stays in XLA; everything else is the kernel.
    tok_emb = jnp.take(tok_table, token_ids.reshape(-1), axis=0)    # (B*L, H) f32
    pos = pos_table[:L]                                             # (L, H)

    # Stack per-layer weights on a leading layer axis; matmul weights in bf16.
    stacked = []
    for name in _PARAM_ORDER:
        a = jnp.stack([blk[name] for blk in blocks])                # (NL, r, c)
        if name in _MATMUL_WEIGHTS:
            a = a.astype(jnp.bfloat16)
        stacked.append(a)

    def _wspec(arr):
        blk = (1,) + arr.shape[1:]
        return pl.BlockSpec(blk, lambda b, l: (l, 0, 0))

    out = pl.pallas_call(
        functools.partial(_bert_layer_kernel, num_heads=num_heads,
                          batch_tile=batch_tile, seq_len=L),
        out_shape=jax.ShapeDtypeStruct((B * L, H), jnp.float32),
        grid_spec=pltpu.PrefetchScalarGridSpec(
            num_scalar_prefetch=0,
            grid=(B // batch_tile, num_layers),
            in_specs=[pl.BlockSpec((rows, H), lambda b, l: (b, 0)),   # token emb tile
                      pl.BlockSpec((L, H), lambda b, l: (0, 0))]      # positional emb
                     + [_wspec(a) for a in stacked],                  # per-layer weights
            out_specs=pl.BlockSpec((rows, H), lambda b, l: (b, 0)),   # x carry / output
            scratch_shapes=[pltpu.VMEM((rows, H), jnp.float32)]),     # head-context pack
        compiler_params=pltpu.CompilerParams(
            dimension_semantics=("parallel", "arbitrary"),
            vmem_limit_bytes=64 * 1024 * 1024),
    )(tok_emb, pos, *stacked)

    return out.reshape(B, L, H), raw_mask


def init_params(key, vocab_size, max_len, hidden, n_layers, d_ff):
    keys = jax.random.split(key, 2 + n_layers)
    tok_table = 0.02 * jax.random.normal(keys[0], (vocab_size, hidden), jnp.float32)
    tok_table = tok_table.at[0].set(0.0)      # nn.Embedding(padding_idx=0)
    pos_table = 0.02 * jax.random.normal(keys[1], (max_len, hidden), jnp.float32)

    def lin(kk, din, dout):
        return 0.05 * jax.random.normal(kk, (din, dout), jnp.float32)

    blocks = []
    for i in range(n_layers):
        k = jax.random.split(keys[2 + i], 6)
        blocks.append(dict(
            wq=lin(k[0], hidden, hidden), bq=jnp.zeros((1, hidden), jnp.float32),
            wk=lin(k[1], hidden, hidden), bk=jnp.zeros((1, hidden), jnp.float32),
            wv=lin(k[2], hidden, hidden), bv=jnp.zeros((1, hidden), jnp.float32),
            wo=lin(k[3], hidden, hidden), bo=jnp.zeros((1, hidden), jnp.float32),
            g1=jnp.ones((1, hidden), jnp.float32), be1=jnp.zeros((1, hidden), jnp.float32),
            g2=jnp.ones((1, hidden), jnp.float32), be2=jnp.zeros((1, hidden), jnp.float32),
            w1=lin(k[4], hidden, d_ff), bf1=jnp.zeros((1, d_ff), jnp.float32),
            w2=lin(k[5], d_ff, hidden), bf2=jnp.zeros((1, hidden), jnp.float32),
        ))
    return tok_table, pos_table, blocks


if __name__ == "__main__":
    # BERT(bert_max_len=8, num_items=50, bert_num_blocks=2, bert_num_heads=2,
    #      bert_hidden_units=32, bert_dropout=0.0)
    B, L, H, NH, NL, VOCAB = 2, 8, 32, 2, 2, 50
    DFF = 4 * H
    key = jax.random.PRNGKey(0)
    k_tok, k_param = jax.random.split(key)
    token_ids = jax.random.randint(k_tok, (B, L), 0, VOCAB, dtype=jnp.int32)

    tok_table, pos_table, blocks = init_params(k_param, VOCAB, L, H, NL, DFF)
    out, raw_mask = bert_forward(token_ids, tok_table, pos_table, blocks, NH,
                                 batch_tile=1)
    jax.block_until_ready(out)
    jax.block_until_ready(raw_mask)
    assert out.shape == (B, L, H) and raw_mask.shape == (B, L)
    assert bool(jnp.all(jnp.isfinite(out)))
    print("KERNEL_OK")
</pallas_src>

<mosaic_0001>
module attributes {stable_mosaic.version = 11 : i64} {
  func.func @_bert_layer_kernel(%arg0: i32, %arg1: i32, %arg2: memref<8x32xf32, #tpu.memory_space<vmem>>, %arg3: memref<8x32xf32, #tpu.memory_space<vmem>>, %arg4: memref<1x32x32xbf16, #tpu.memory_space<vmem>>, %arg5: memref<1x1x32xf32, #tpu.memory_space<vmem>>, %arg6: memref<1x32x32xbf16, #tpu.memory_space<vmem>>, %arg7: memref<1x1x32xf32, #tpu.memory_space<vmem>>, %arg8: memref<1x32x32xbf16, #tpu.memory_space<vmem>>, %arg9: memref<1x1x32xf32, #tpu.memory_space<vmem>>, %arg10: memref<1x32x32xbf16, #tpu.memory_space<vmem>>, %arg11: memref<1x1x32xf32, #tpu.memory_space<vmem>>, %arg12: memref<1x1x32xf32, #tpu.memory_space<vmem>>, %arg13: memref<1x1x32xf32, #tpu.memory_space<vmem>>, %arg14: memref<1x1x32xf32, #tpu.memory_space<vmem>>, %arg15: memref<1x1x32xf32, #tpu.memory_space<vmem>>, %arg16: memref<1x32x128xbf16, #tpu.memory_space<vmem>>, %arg17: memref<1x1x128xf32, #tpu.memory_space<vmem>>, %arg18: memref<1x128x32xbf16, #tpu.memory_space<vmem>>, %arg19: memref<1x1x32xf32, #tpu.memory_space<vmem>>, %arg20: memref<8x32xf32, #tpu.memory_space<vmem>>, %arg21: memref<8x32xf32, #tpu.memory_space<vmem>>) attributes {dimension_semantics = [#tpu.dimension_semantics<parallel>, #tpu.dimension_semantics<arbitrary>], iteration_bounds = array<i64: 2, 2>, scalar_prefetch = 0 : i64, scratch_operands = 1 : i64, tpu.core_type = #tpu.core_type<tc>, window_params = [{transform_indices = @transform_0, window_bounds = array<i64: 8, 32>}, {pipeline_mode = #tpu.pipeline_mode<synchronous>, transform_indices = @transform_1, window_bounds = array<i64: 8, 32>}, {transform_indices = @transform_2, window_bounds = array<i64: 1, 32, 32>}, {transform_indices = @transform_3, window_bounds = array<i64: 1, 1, 32>}, {transform_indices = @transform_4, window_bounds = array<i64: 1, 32, 32>}, {transform_indices = @transform_5, window_bounds = array<i64: 1, 1, 32>}, {transform_indices = @transform_6, window_bounds = array<i64: 1, 32, 32>}, {transform_indices = @transform_7, window_bounds = array<i64: 1, 1, 32>}, {transform_indices = @transform_8, window_bounds = array<i64: 1, 32, 32>}, {transform_indices = @transform_9, window_bounds = array<i64: 1, 1, 32>}, {transform_indices = @transform_10, window_bounds = array<i64: 1, 1, 32>}, {transform_indices = @transform_11, window_bounds = array<i64: 1, 1, 32>}, {transform_indices = @transform_12, window_bounds = array<i64: 1, 1, 32>}, {transform_indices = @transform_13, window_bounds = array<i64: 1, 1, 32>}, {transform_indices = @transform_14, window_bounds = array<i64: 1, 32, 128>}, {transform_indices = @transform_15, window_bounds = array<i64: 1, 1, 128>}, {transform_indices = @transform_16, window_bounds = array<i64: 1, 128, 32>}, {transform_indices = @transform_17, window_bounds = array<i64: 1, 1, 32>}, {transform_indices = @transform_18, window_bounds = array<i64: 8, 32>}]} {
    %c0_i32 = arith.constant 0 : i32
    %0 = arith.cmpi eq, %arg1, %c0_i32 : i32
    %1 = arith.extui %0 : i1 to i32
    %c0_i32_0 = arith.constant 0 : i32
    %2 = arith.cmpi ne, %1, %c0_i32_0 : i32
    scf.if %2 {
      %c0_85 = arith.constant 0 : index
      %c0_86 = arith.constant 0 : index
      %159 = vector.load %arg3[%c0_85, %c0_86] : memref<8x32xf32, #tpu.memory_space<vmem>>, vector<8x32xf32>
      %c0_87 = arith.constant 0 : index
      %c0_88 = arith.constant 0 : index
      %160 = vector.load %arg2[%c0_87, %c0_88] : memref<8x32xf32, #tpu.memory_space<vmem>>, vector<8x32xf32>
      %161 = arith.addf %160, %159 : vector<8x32xf32>
      %162 = tpu.iota {dimensions = array<i32: 0>} : vector<8x1xi32>
      %c8_i32 = arith.constant 8 : i32
      %c0_i32_89 = arith.constant 0 : i32
      %163 = arith.cmpi eq, %c8_i32, %c0_i32_89 : i32
      %c1_i32 = arith.constant 1 : i32
      %164 = arith.select %163, %c1_i32, %c8_i32 : i32
      %165 = vector.broadcast %164 : i32 to vector<8x1xi32>
      %166 = arith.remsi %162, %165 : vector<8x1xi32>
      %c0_i32_90 = arith.constant 0 : i32
      %167 = vector.broadcast %c0_i32_90 : i32 to vector<8x1xi32>
      %168 = arith.cmpi ne, %166, %167 : vector<8x1xi32>
      %c0_i32_91 = arith.constant 0 : i32
      %169 = vector.broadcast %c0_i32_91 : i32 to vector<8x1xi32>
      %170 = arith.cmpi slt, %166, %169 : vector<8x1xi32>
      %c0_i32_92 = arith.constant 0 : i32
      %171 = arith.cmpi slt, %164, %c0_i32_92 : i32
      %172 = vector.broadcast %171 : i1 to vector<8x1xi1>
      %173 = vector.broadcast %172 : vector<8x1xi1> to vector<8x1xi1>
      %174 = arith.xori %170, %173 : vector<8x1xi1>
      %175 = arith.andi %174, %168 : vector<8x1xi1>
      %176 = vector.broadcast %164 : i32 to vector<8x1xi32>
      %177 = arith.addi %166, %176 : vector<8x1xi32>
      %178 = arith.select %175, %177, %166 : vector<8x1xi1>, vector<8x1xi32>
      %c7_i32 = arith.constant 7 : i32
      %179 = vector.broadcast %c7_i32 : i32 to vector<8x1xi32>
      %180 = arith.cmpi eq, %178, %179 : vector<8x1xi32>
      %cst_93 = arith.constant 0.000000e+00 : f32
      %181 = vector.shape_cast %180 : vector<8x1xi1> to vector<8x1xi1>
      %182 = vector.broadcast %181 : vector<8x1xi1> to vector<8x32xi1>
      %183 = vector.broadcast %cst_93 : f32 to vector<8x32xf32>
      %184 = arith.select %182, %183, %161 : vector<8x32xi1>, vector<8x32xf32>
      %c0_94 = arith.constant 0 : index
      %c0_95 = arith.constant 0 : index
      %185 = vector.load %arg20[%c0_94, %c0_95] : memref<8x32xf32, #tpu.memory_space<vmem>>, vector<8x32xf32>
      tpu.vector_store %arg20[%c0_94, %c0_95], %184 {strides = array<i32>} : memref<8x32xf32, #tpu.memory_space<vmem>>, vector<8x32xf32>,
    } else {
    }
    %c0 = arith.constant 0 : index
    %c0_1 = arith.constant 0 : index
    %3 = vector.load %arg20[%c0, %c0_1] : memref<8x32xf32, #tpu.memory_space<vmem>>, vector<8x32xf32>
    %c0_2 = arith.constant 0 : index
    %c0_3 = arith.constant 0 : index
    %c0_4 = arith.constant 0 : index
    %4 = vector.load %arg4[%c0_2, %c0_3, %c0_4] : memref<1x32x32xbf16, #tpu.memory_space<vmem>>, vector<1x32x32xbf16>
    %5 = vector.shape_cast %4 : vector<1x32x32xbf16> to vector<32x32xbf16>
    %c0_5 = arith.constant 0 : index
    %c0_6 = arith.constant 0 : index
    %c0_7 = arith.constant 0 : index
    %6 = vector.load %arg6[%c0_5, %c0_6, %c0_7] : memref<1x32x32xbf16, #tpu.memory_space<vmem>>, vector<1x32x32xbf16>
    %7 = vector.shape_cast %6 : vector<1x32x32xbf16> to vector<32x32xbf16>
    %c0_8 = arith.constant 0 : index
    %c0_9 = arith.constant 0 : index
    %c0_10 = arith.constant 0 : index
    %8 = vector.load %arg8[%c0_8, %c0_9, %c0_10] : memref<1x32x32xbf16, #tpu.memory_space<vmem>>, vector<1x32x32xbf16>
    %9 = vector.shape_cast %8 : vector<1x32x32xbf16> to vector<32x32xbf16>
    %c0_11 = arith.constant 0 : index
    %c0_12 = arith.constant 0 : index
    %c0_13 = arith.constant 0 : index
    %10 = vector.load %arg10[%c0_11, %c0_12, %c0_13] : memref<1x32x32xbf16, #tpu.memory_space<vmem>>, vector<1x32x32xbf16>
    %11 = vector.shape_cast %10 : vector<1x32x32xbf16> to vector<32x32xbf16>
    %c0_14 = arith.constant 0 : index
    %c0_15 = arith.constant 0 : index
    %c0_16 = arith.constant 0 : index
    %12 = vector.load %arg16[%c0_14, %c0_15, %c0_16] : memref<1x32x128xbf16, #tpu.memory_space<vmem>>, vector<1x32x128xbf16>
    %13 = vector.shape_cast %12 : vector<1x32x128xbf16> to vector<32x128xbf16>
    %c0_17 = arith.constant 0 : index
    %c0_18 = arith.constant 0 : index
    %c0_19 = arith.constant 0 : index
    %14 = vector.load %arg18[%c0_17, %c0_18, %c0_19] : memref<1x128x32xbf16, #tpu.memory_space<vmem>>, vector<1x128x32xbf16>
    %15 = vector.shape_cast %14 : vector<1x128x32xbf16> to vector<128x32xbf16>
    %c0_20 = arith.constant 0 : index
    %c0_21 = arith.constant 0 : index
    %c0_22 = arith.constant 0 : index
    %16 = vector.load %arg5[%c0_20, %c0_21, %c0_22] : memref<1x1x32xf32, #tpu.memory_space<vmem>>, vector<1x1x32xf32>
    %17 = vector.shape_cast %16 : vector<1x1x32xf32> to vector<1x32xf32>
    %c0_23 = arith.constant 0 : index
    %c0_24 = arith.constant 0 : index
    %c0_25 = arith.constant 0 : index
    %18 = vector.load %arg7[%c0_23, %c0_24, %c0_25] : memref<1x1x32xf32, #tpu.memory_space<vmem>>, vector<1x1x32xf32>
    %19 = vector.shape_cast %18 : vector<1x1x32xf32> to vector<1x32xf32>
    %c0_26 = arith.constant 0 : index
    %c0_27 = arith.constant 0 : index
    %c0_28 = arith.constant 0 : index
    %20 = vector.load %arg9[%c0_26, %c0_27, %c0_28] : memref<1x1x32xf32, #tpu.memory_space<vmem>>, vector<1x1x32xf32>
    %21 = vector.shape_cast %20 : vector<1x1x32xf32> to vector<1x32xf32>
    %c0_29 = arith.constant 0 : index
    %c0_30 = arith.constant 0 : index
    %c0_31 = arith.constant 0 : index
    %22 = vector.load %arg11[%c0_29, %c0_30, %c0_31] : memref<1x1x32xf32, #tpu.memory_space<vmem>>, vector<1x1x32xf32>
    %23 = vector.shape_cast %22 : vector<1x1x32xf32> to vector<1x32xf32>
    %c0_32 = arith.constant 0 : index
    %c0_33 = arith.constant 0 : index
    %c0_34 = arith.constant 0 : index
    %24 = vector.load %arg17[%c0_32, %c0_33, %c0_34] : memref<1x1x128xf32, #tpu.memory_space<vmem>>, vector<1x1x128xf32>
    %25 = vector.shape_cast %24 : vector<1x1x128xf32> to vector<1x128xf32>
    %c0_35 = arith.constant 0 : index
    %c0_36 = arith.constant 0 : index
    %c0_37 = arith.constant 0 : index
    %26 = vector.load %arg19[%c0_35, %c0_36, %c0_37] : memref<1x1x32xf32, #tpu.memory_space<vmem>>, vector<1x1x32xf32>
    %27 = vector.shape_cast %26 : vector<1x1x32xf32> to vector<1x32xf32>
    %c0_38 = arith.constant 0 : index
    %c0_39 = arith.constant 0 : index
    %c0_40 = arith.constant 0 : index
    %28 = vector.load %arg12[%c0_38, %c0_39, %c0_40] : memref<1x1x32xf32, #tpu.memory_space<vmem>>, vector<1x1x32xf32>
    %29 = vector.shape_cast %28 : vector<1x1x32xf32> to vector<1x32xf32>
    %c0_41 = arith.constant 0 : index
    %c0_42 = arith.constant 0 : index
    %c0_43 = arith.constant 0 : index
    %30 = vector.load %arg13[%c0_41, %c0_42, %c0_43] : memref<1x1x32xf32, #tpu.memory_space<vmem>>, vector<1x1x32xf32>
    %31 = vector.shape_cast %30 : vector<1x1x32xf32> to vector<1x32xf32>
    %c0_44 = arith.constant 0 : index
    %c0_45 = arith.constant 0 : index
    %c0_46 = arith.constant 0 : index
    %32 = vector.load %arg14[%c0_44, %c0_45, %c0_46] : memref<1x1x32xf32, #tpu.memory_space<vmem>>, vector<1x1x32xf32>
    %33 = vector.shape_cast %32 : vector<1x1x32xf32> to vector<1x32xf32>
    %c0_47 = arith.constant 0 : index
    %c0_48 = arith.constant 0 : index
    %c0_49 = arith.constant 0 : index
    %34 = vector.load %arg15[%c0_47, %c0_48, %c0_49] : memref<1x1x32xf32, #tpu.memory_space<vmem>>, vector<1x1x32xf32>
    %35 = vector.shape_cast %34 : vector<1x1x32xf32> to vector<1x32xf32>
    %cst = arith.constant dense<0.000000e+00> : vector<8xf32>
    %36 = vector.multi_reduction <add>, %3, %cst [1] : vector<8x32xf32> to vector<8xf32>
    %37 = vector.shape_cast %36 : vector<8xf32> to vector<8x1xf32>
    %cst_50 = arith.constant 3.200000e+01 : f32
    %38 = vector.broadcast %cst_50 : f32 to vector<8x1xf32>
    %39 = arith.divf %37, %38 : vector<8x1xf32>
    %40 = vector.broadcast %39 : vector<8x1xf32> to vector<8x32xf32>
    %41 = arith.subf %3, %40 : vector<8x32xf32>
    %42 = arith.mulf %41, %41 : vector<8x32xf32>
    %cst_51 = arith.constant dense<0.000000e+00> : vector<8xf32>
    %43 = vector.multi_reduction <add>, %42, %cst_51 [1] : vector<8x32xf32> to vector<8xf32>
    %44 = vector.shape_cast %43 : vector<8xf32> to vector<8x1xf32>
    %cst_52 = arith.constant 3.100000e+01 : f32
    %45 = vector.broadcast %cst_52 : f32 to vector<8x1xf32>
    %46 = arith.divf %44, %45 : vector<8x1xf32>
    %47 = math.sqrt %46 : vector<8x1xf32>
    %cst_53 = arith.constant 9.99999997E-7 : f32
    %48 = vector.broadcast %cst_53 : f32 to vector<8x1xf32>
    %49 = arith.addf %47, %48 : vector<8x1xf32>
    %50 = tpu.reciprocal %49 {approx = true} : vector<8x1xf32> -> vector<8x1xf32>
    %51 = vector.broadcast %29 : vector<1x32xf32> to vector<8x32xf32>
    %52 = arith.mulf %51, %41 : vector<8x32xf32>
    %53 = vector.broadcast %50 : vector<8x1xf32> to vector<8x32xf32>
    %54 = arith.mulf %52, %53 : vector<8x32xf32>
    %55 = vector.broadcast %31 : vector<1x32xf32> to vector<8x32xf32>
    %56 = arith.addf %54, %55 : vector<8x32xf32>
    %57 = arith.truncf %56 : vector<8x32xf32> to vector<8x32xbf16>
    %cst_54 = arith.constant dense<0.000000e+00> : vector<8x32xf32>
    %58 = tpu.matmul %57, %5, %cst_54 {dimension_numbers = #tpu.dot_dimension_numbers<[1], [0], [0], [1], [0, 0, 1, 1], [], []>} : vector<8x32xbf16>, vector<32x32xbf16>, vector<8x32xf32> -> vector<8x32xf32>
    %59 = vector.broadcast %17 : vector<1x32xf32> to vector<8x32xf32>
    %60 = arith.addf %58, %59 : vector<8x32xf32>
    %cst_55 = arith.constant 2.500000e-01 : f32
    %61 = vector.broadcast %cst_55 : f32 to vector<8x32xf32>
    %62 = arith.mulf %60, %61 : vector<8x32xf32>
    %cst_56 = arith.constant dense<0.000000e+00> : vector<8x32xf32>
    %63 = tpu.matmul %57, %7, %cst_56 {dimension_numbers = #tpu.dot_dimension_numbers<[1], [0], [0], [1], [0, 0, 1, 1], [], []>} : vector<8x32xbf16>, vector<32x32xbf16>, vector<8x32xf32> -> vector<8x32xf32>
    %64 = vector.broadcast %19 : vector<1x32xf32> to vector<8x32xf32>
    %65 = arith.addf %63, %64 : vector<8x32xf32>
    %cst_57 = arith.constant dense<0.000000e+00> : vector<8x32xf32>
    %66 = tpu.matmul %57, %9, %cst_57 {dimension_numbers = #tpu.dot_dimension_numbers<[1], [0], [0], [1], [0, 0, 1, 1], [], []>} : vector<8x32xbf16>, vector<32x32xbf16>, vector<8x32xf32> -> vector<8x32xf32>
    %67 = vector.broadcast %21 : vector<1x32xf32> to vector<8x32xf32>
    %68 = arith.addf %66, %67 : vector<8x32xf32>
    %69 = vector.extract_strided_slice %62 {offsets = [0, 0], sizes = [8, 16], strides = [1, 1]} : vector<8x32xf32> to vector<8x16xf32>
    %70 = arith.truncf %69 : vector<8x16xf32> to vector<8x16xbf16>
    %71 = vector.extract_strided_slice %65 {offsets = [0, 0], sizes = [8, 16], strides = [1, 1]} : vector<8x32xf32> to vector<8x16xf32>
    %72 = arith.truncf %71 : vector<8x16xf32> to vector<8x16xbf16>
    %73 = vector.extract_strided_slice %68 {offsets = [0, 0], sizes = [8, 16], strides = [1, 1]} : vector<8x32xf32> to vector<8x16xf32>
    %74 = arith.truncf %73 : vector<8x16xf32> to vector<8x16xbf16>
    %cst_58 = arith.constant dense<0.000000e+00> : vector<8x8xf32>
    %75 = tpu.matmul %70, %72, %cst_58 {dimension_numbers = #tpu.dot_dimension_numbers<[1], [1], [0], [0], [0, 0, 1, 0], [], []>} : vector<8x16xbf16>, vector<8x16xbf16>, vector<8x8xf32> -> vector<8x8xf32>
    %cst_59 = arith.constant dense<0xFF800000> : vector<8xf32>
    %76 = vector.multi_reduction <maximumf>, %75, %cst_59 [1] : vector<8x8xf32> to vector<8xf32>
    %77 = vector.shape_cast %76 : vector<8xf32> to vector<8x1xf32>
    %78 = vector.broadcast %77 : vector<8x1xf32> to vector<8x8xf32>
    %79 = arith.subf %75, %78 : vector<8x8xf32>
    %80 = math.exp %79 : vector<8x8xf32>
    %cst_60 = arith.constant dense<0.000000e+00> : vector<8xf32>
    %81 = vector.multi_reduction <add>, %80, %cst_60 [1] : vector<8x8xf32> to vector<8xf32>
    %82 = vector.shape_cast %81 : vector<8xf32> to vector<8x1xf32>
    %83 = tpu.reciprocal %82 {approx = true} : vector<8x1xf32> -> vector<8x1xf32>
    %84 = vector.broadcast %83 : vector<8x1xf32> to vector<8x8xf32>
    %85 = arith.mulf %80, %84 : vector<8x8xf32>
    %86 = arith.truncf %85 : vector<8x8xf32> to vector<8x8xbf16>
    %cst_61 = arith.constant dense<0.000000e+00> : vector<8x16xf32>
    %87 = tpu.matmul %86, %74, %cst_61 {dimension_numbers = #tpu.dot_dimension_numbers<[1], [0], [0], [1], [0, 0, 1, 1], [], []>} : vector<8x8xbf16>, vector<8x16xbf16>, vector<8x16xf32> -> vector<8x16xf32>
    %c0_62 = arith.constant 0 : index
    %c0_63 = arith.constant 0 : index
    %88 = vector.load %arg21[%c0_62, %c0_63] : memref<8x32xf32, #tpu.memory_space<vmem>>, vector<8x16xf32>
    tpu.vector_store %arg21[%c0_62, %c0_63], %87 {strides = array<i32>} : memref<8x32xf32, #tpu.memory_space<vmem>>, vector<8x16xf32>,
    %89 = vector.extract_strided_slice %62 {offsets = [0, 16], sizes = [8, 16], strides = [1, 1]} : vector<8x32xf32> to vector<8x16xf32>
    %90 = arith.truncf %89 : vector<8x16xf32> to vector<8x16xbf16>
    %91 = vector.extract_strided_slice %65 {offsets = [0, 16], sizes = [8, 16], strides = [1, 1]} : vector<8x32xf32> to vector<8x16xf32>
    %92 = arith.truncf %91 : vector<8x16xf32> to vector<8x16xbf16>
    %93 = vector.extract_strided_slice %68 {offsets = [0, 16], sizes = [8, 16], strides = [1, 1]} : vector<8x32xf32> to vector<8x16xf32>
    %94 = arith.truncf %93 : vector<8x16xf32> to vector<8x16xbf16>
    %cst_64 = arith.constant dense<0.000000e+00> : vector<8x8xf32>
    %95 = tpu.matmul %90, %92, %cst_64 {dimension_numbers = #tpu.dot_dimension_numbers<[1], [1], [0], [0], [0, 0, 1, 0], [], []>} : vector<8x16xbf16>, vector<8x16xbf16>, vector<8x8xf32> -> vector<8x8xf32>
    %cst_65 = arith.constant dense<0xFF800000> : vector<8xf32>
    %96 = vector.multi_reduction <maximumf>, %95, %cst_65 [1] : vector<8x8xf32> to vector<8xf32>
    %97 = vector.shape_cast %96 : vector<8xf32> to vector<8x1xf32>
    %98 = vector.broadcast %97 : vector<8x1xf32> to vector<8x8xf32>
    %99 = arith.subf %95, %98 : vector<8x8xf32>
    %100 = math.exp %99 : vector<8x8xf32>
    %cst_66 = arith.constant dense<0.000000e+00> : vector<8xf32>
    %101 = vector.multi_reduction <add>, %100, %cst_66 [1] : vector<8x8xf32> to vector<8xf32>
    %102 = vector.shape_cast %101 : vector<8xf32> to vector<8x1xf32>
    %103 = tpu.reciprocal %102 {approx = true} : vector<8x1xf32> -> vector<8x1xf32>
    %104 = vector.broadcast %103 : vector<8x1xf32> to vector<8x8xf32>
    %105 = arith.mulf %100, %104 : vector<8x8xf32>
    %106 = arith.truncf %105 : vector<8x8xf32> to vector<8x8xbf16>
    %cst_67 = arith.constant dense<0.000000e+00> : vector<8x16xf32>
    %107 = tpu.matmul %106, %94, %cst_67 {dimension_numbers = #tpu.dot_dimension_numbers<[1], [0], [0], [1], [0, 0, 1, 1], [], []>} : vector<8x8xbf16>, vector<8x16xbf16>, vector<8x16xf32> -> vector<8x16xf32>
    %c0_68 = arith.constant 0 : index
    %c16 = arith.constant 16 : index
    %108 = vector.load %arg21[%c0_68, %c16] : memref<8x32xf32, #tpu.memory_space<vmem>>, vector<8x16xf32>
    tpu.vector_store %arg21[%c0_68, %c16], %107 {strides = array<i32>} : memref<8x32xf32, #tpu.memory_space<vmem>>, vector<8x16xf32>,
    %c0_69 = arith.constant 0 : index
    %c0_70 = arith.constant 0 : index
    %109 = vector.load %arg21[%c0_69, %c0_70] : memref<8x32xf32, #tpu.memory_space<vmem>>, vector<8x32xf32>
    %110 = arith.truncf %109 : vector<8x32xf32> to vector<8x32xbf16>
    %cst_71 = arith.constant dense<0.000000e+00> : vector<8x32xf32>
    %111 = tpu.matmul %110, %11, %cst_71 {dimension_numbers = #tpu.dot_dimension_numbers<[1], [0], [0], [1], [0, 0, 1, 1], [], []>} : vector<8x32xbf16>, vector<32x32xbf16>, vector<8x32xf32> -> vector<8x32xf32>
    %112 = vector.broadcast %23 : vector<1x32xf32> to vector<8x32xf32>
    %113 = arith.addf %111, %112 : vector<8x32xf32>
    %114 = arith.addf %3, %113 : vector<8x32xf32>
    %cst_72 = arith.constant dense<0.000000e+00> : vector<8xf32>
    %115 = vector.multi_reduction <add>, %114, %cst_72 [1] : vector<8x32xf32> to vector<8xf32>
    %116 = vector.shape_cast %115 : vector<8xf32> to vector<8x1xf32>
    %cst_73 = arith.constant 3.200000e+01 : f32
    %117 = vector.broadcast %cst_73 : f32 to vector<8x1xf32>
    %118 = arith.divf %116, %117 : vector<8x1xf32>
    %119 = vector.broadcast %118 : vector<8x1xf32> to vector<8x32xf32>
    %120 = arith.subf %114, %119 : vector<8x32xf32>
    %121 = arith.mulf %120, %120 : vector<8x32xf32>
    %cst_74 = arith.constant dense<0.000000e+00> : vector<8xf32>
    %122 = vector.multi_reduction <add>, %121, %cst_74 [1] : vector<8x32xf32> to vector<8xf32>
    %123 = vector.shape_cast %122 : vector<8xf32> to vector<8x1xf32>
    %cst_75 = arith.constant 3.100000e+01 : f32
    %124 = vector.broadcast %cst_75 : f32 to vector<8x1xf32>
    %125 = arith.divf %123, %124 : vector<8x1xf32>
    %126 = math.sqrt %125 : vector<8x1xf32>
    %cst_76 = arith.constant 9.99999997E-7 : f32
    %127 = vector.broadcast %cst_76 : f32 to vector<8x1xf32>
    %128 = arith.addf %126, %127 : vector<8x1xf32>
    %129 = tpu.reciprocal %128 {approx = true} : vector<8x1xf32> -> vector<8x1xf32>
    %130 = vector.broadcast %33 : vector<1x32xf32> to vector<8x32xf32>
    %131 = arith.mulf %130, %120 : vector<8x32xf32>
    %132 = vector.broadcast %129 : vector<8x1xf32> to vector<8x32xf32>
    %133 = arith.mulf %131, %132 : vector<8x32xf32>
    %134 = vector.broadcast %35 : vector<1x32xf32> to vector<8x32xf32>
    %135 = arith.addf %133, %134 : vector<8x32xf32>
    %136 = arith.truncf %135 : vector<8x32xf32> to vector<8x32xbf16>
    %cst_77 = arith.constant dense<0.000000e+00> : vector<8x128xf32>
    %137 = tpu.matmul %136, %13, %cst_77 {dimension_numbers = #tpu.dot_dimension_numbers<[1], [0], [0], [1], [0, 0, 1, 1], [], []>} : vector<8x32xbf16>, vector<32x128xbf16>, vector<8x128xf32> -> vector<8x128xf32>
    %138 = vector.broadcast %25 : vector<1x128xf32> to vector<8x128xf32>
    %139 = arith.addf %137, %138 : vector<8x128xf32>
    %cst_78 = arith.constant 5.000000e-01 : f32
    %140 = vector.broadcast %cst_78 : f32 to vector<8x128xf32>
    %141 = arith.mulf %140, %139 : vector<8x128xf32>
    %cst_79 = arith.constant 4.471500e-02 : f32
    %142 = vector.broadcast %cst_79 : f32 to vector<8x128xf32>
    %143 = arith.mulf %142, %139 : vector<8x128xf32>
    %144 = arith.mulf %143, %139 : vector<8x128xf32>
    %145 = arith.mulf %144, %139 : vector<8x128xf32>
    %146 = arith.addf %139, %145 : vector<8x128xf32>
    %cst_80 = arith.constant 0.797884583 : f32
    %147 = vector.broadcast %cst_80 : f32 to vector<8x128xf32>
    %148 = arith.mulf %147, %146 : vector<8x128xf32>
    %149 = math.tanh %148 : vector<8x128xf32>
    %cst_81 = arith.constant 1.000000e+00 : f32
    %150 = vector.broadcast %cst_81 : f32 to vector<8x128xf32>
    %151 = arith.addf %150, %149 : vector<8x128xf32>
    %152 = arith.mulf %141, %151 : vector<8x128xf32>
    %153 = arith.truncf %152 : vector<8x128xf32> to vector<8x128xbf16>
    %cst_82 = arith.constant dense<0.000000e+00> : vector<8x32xf32>
    %154 = tpu.matmul %153, %15, %cst_82 {dimension_numbers = #tpu.dot_dimension_numbers<[1], [0], [0], [1], [0, 0, 1, 1], [], []>} : vector<8x128xbf16>, vector<128x32xbf16>, vector<8x32xf32> -> vector<8x32xf32>
    %155 = vector.broadcast %27 : vector<1x32xf32> to vector<8x32xf32>
    %156 = arith.addf %154, %155 : vector<8x32xf32>
    %157 = arith.addf %114, %156 : vector<8x32xf32>
    %c0_83 = arith.constant 0 : index
    %c0_84 = arith.constant 0 : index
    %158 = vector.load %arg20[%c0_83, %c0_84] : memref<8x32xf32, #tpu.memory_space<vmem>>, vector<8x32xf32>
    tpu.vector_store %arg20[%c0_83, %c0_84], %157 {strides = array<i32>} : memref<8x32xf32, #tpu.memory_space<vmem>>, vector<8x32xf32>,
    return
  }
  func.func @transform_0(%arg0: i32, %arg1: i32) -> (i32, i32) {
    %c0_i32 = arith.constant 0 : i32
    %c0_i32_0 = arith.constant 0 : i32
    return %arg0, %c0_i32 : i32, i32
  }
  func.func @transform_1(%arg0: i32, %arg1: i32) -> (i32, i32) {
    %c0_i32 = arith.constant 0 : i32
    %c0_i32_0 = arith.constant 0 : i32
    %c0_i32_1 = arith.constant 0 : i32
    return %c0_i32, %c0_i32_0 : i32, i32
  }
  func.func @transform_2(%arg0: i32, %arg1: i32) -> (i32, i32, i32) {
    %c0_i32 = arith.constant 0 : i32
    %c0_i32_0 = arith.constant 0 : i32
    %c0_i32_1 = arith.constant 0 : i32
    return %arg1, %c0_i32, %c0_i32_0 : i32, i32, i32
  }
  func.func @transform_3(%arg0: i32, %arg1: i32) -> (i32, i32, i32) {
    %c0_i32 = arith.constant 0 : i32
    %c0_i32_0 = arith.constant 0 : i32
    %c0_i32_1 = arith.constant 0 : i32
    return %arg1, %c0_i32, %c0_i32_0 : i32, i32, i32
  }
  func.func @transform_4(%arg0: i32, %arg1: i32) -> (i32, i32, i32) {
    %c0_i32 = arith.constant 0 : i32
    %c0_i32_0 = arith.constant 0 : i32
    %c0_i32_1 = arith.constant 0 : i32
    return %arg1, %c0_i32, %c0_i32_0 : i32, i32, i32
  }
  func.func @transform_5(%arg0: i32, %arg1: i32) -> (i32, i32, i32) {
    %c0_i32 = arith.constant 0 : i32
    %c0_i32_0 = arith.constant 0 : i32
    %c0_i32_1 = arith.constant 0 : i32
    return %arg1, %c0_i32, %c0_i32_0 : i32, i32, i32
  }
  func.func @transform_6(%arg0: i32, %arg1: i32) -> (i32, i32, i32) {
    %c0_i32 = arith.constant 0 : i32
    %c0_i32_0 = arith.constant 0 : i32
    %c0_i32_1 = arith.constant 0 : i32
    return %arg1, %c0_i32, %c0_i32_0 : i32, i32, i32
  }
  func.func @transform_7(%arg0: i32, %arg1: i32) -> (i32, i32, i32) {
    %c0_i32 = arith.constant 0 : i32
    %c0_i32_0 = arith.constant 0 : i32
    %c0_i32_1 = arith.constant 0 : i32
    return %arg1, %c0_i32, %c0_i32_0 : i32, i32, i32
  }
  func.func @transform_8(%arg0: i32, %arg1: i32) -> (i32, i32, i32) {
    %c0_i32 = arith.constant 0 : i32
    %c0_i32_0 = arith.constant 0 : i32
    %c0_i32_1 = arith.constant 0 : i32
    return %arg1, %c0_i32, %c0_i32_0 : i32, i32, i32
  }
  func.func @transform_9(%arg0: i32, %arg1: i32) -> (i32, i32, i32) {
    %c0_i32 = arith.constant 0 : i32
    %c0_i32_0 = arith.constant 0 : i32
    %c0_i32_1 = arith.constant 0 : i32
    return %arg1, %c0_i32, %c0_i32_0 : i32, i32, i32
  }
  func.func @transform_10(%arg0: i32, %arg1: i32) -> (i32, i32, i32) {
    %c0_i32 = arith.constant 0 : i32
    %c0_i32_0 = arith.constant 0 : i32
    %c0_i32_1 = arith.constant 0 : i32
    return %arg1, %c0_i32, %c0_i32_0 : i32, i32, i32
  }
  func.func @transform_11(%arg0: i32, %arg1: i32) -> (i32, i32, i32) {
    %c0_i32 = arith.constant 0 : i32
    %c0_i32_0 = arith.constant 0 : i32
    %c0_i32_1 = arith.constant 0 : i32
    return %arg1, %c0_i32, %c0_i32_0 : i32, i32, i32
  }
  func.func @transform_12(%arg0: i32, %arg1: i32) -> (i32, i32, i32) {
    %c0_i32 = arith.constant 0 : i32
    %c0_i32_0 = arith.constant 0 : i32
    %c0_i32_1 = arith.constant 0 : i32
    return %arg1, %c0_i32, %c0_i32_0 : i32, i32, i32
  }
  func.func @transform_13(%arg0: i32, %arg1: i32) -> (i32, i32, i32) {
    %c0_i32 = arith.constant 0 : i32
    %c0_i32_0 = arith.constant 0 : i32
    %c0_i32_1 = arith.constant 0 : i32
    return %arg1, %c0_i32, %c0_i32_0 : i32, i32, i32
  }
  func.func @transform_14(%arg0: i32, %arg1: i32) -> (i32, i32, i32) {
    %c0_i32 = arith.constant 0 : i32
    %c0_i32_0 = arith.constant 0 : i32
    %c0_i32_1 = arith.constant 0 : i32
    return %arg1, %c0_i32, %c0_i32_0 : i32, i32, i32
  }
  func.func @transform_15(%arg0: i32, %arg1: i32) -> (i32, i32, i32) {
    %c0_i32 = arith.constant 0 : i32
    %c0_i32_0 = arith.constant 0 : i32
    %c0_i32_1 = arith.constant 0 : i32
    return %arg1, %c0_i32, %c0_i32_0 : i32, i32, i32
  }
  func.func @transform_16(%arg0: i32, %arg1: i32) -> (i32, i32, i32) {
    %c0_i32 = arith.constant 0 : i32
    %c0_i32_0 = arith.constant 0 : i32
    %c0_i32_1 = arith.constant 0 : i32
    return %arg1, %c0_i32, %c0_i32_0 : i32, i32, i32
  }
  func.func @transform_17(%arg0: i32, %arg1: i32) -> (i32, i32, i32) {
    %c0_i32 = arith.constant 0 : i32
    %c0_i32_0 = arith.constant 0 : i32
    %c0_i32_1 = arith.constant 0 : i32
    return %arg1, %c0_i32, %c0_i32_0 : i32, i32, i32
  }
  func.func @transform_18(%arg0: i32, %arg1: i32) -> (i32, i32) {
    %c0_i32 = arith.constant 0 : i32
    %c0_i32_0 = arith.constant 0 : i32
    return %arg0, %c0_i32 : i32, i32
  }
}

</mosaic_0001>

<bundles_post_ra>
// kernel: tpu_custom_call.1
= control target key start
LH: loop header
LB: loop body
LE: loop exit
PB: predicated region body
PF: predicated region fallthrough
CT: control target
= control target key end

     0   :  { %s2851_s0 = inlined_call_operand.hbm [shape: f32[16,32], index: 0, kind: input, shape index: {}]   ;;  %s2852_s1 = inlined_call_operand.hbm [shape: f32[8,32], index: 1, kind: input, shape index: {}]   ;;  %s2853_s2 = inlined_call_operand.vmem [shape: bf16[2,32,32], index: 2, kind: input, shape index: {}]   ;;  %s2854_s3 = inlined_call_operand.hbm [shape: f32[2,1,32], index: 3, kind: input, shape index: {}]   ;;  %s2855_s4 = inlined_call_operand.vmem [shape: bf16[2,32,32], index: 4, kind: input, shape index: {}]   ;;  %s2856_s5 = inlined_call_operand.vmem [shape: f32[2,1,32], index: 5, kind: input, shape index: {}]   ;;  %s2857_s6 = inlined_call_operand.vmem [shape: bf16[2,32,32], index: 6, kind: input, shape index: {}]   ;;  %s2858_s7 = inlined_call_operand.vmem [shape: f32[2,1,32], index: 7, kind: input, shape index: {}]   ;;  %s2859_s8 = inlined_call_operand.vmem [shape: bf16[2,32,32], index: 8, kind: input, shape index: {}]   ;;  %s2860_s9 = inlined_call_operand.vmem [shape: f32[2,1,32], index: 9, kind: input, shape index: {}]   ;;  %s2861_s10 = inlined_call_operand.vmem [shape: f32[2,1,32], index: 10, kind: input, shape index: {}]   ;;  %s2862_s11 = inlined_call_operand.hbm [shape: f32[2,1,32], index: 11, kind: input, shape index: {}]   ;;  %s2863_s12 = inlined_call_operand.vmem [shape: f32[2,1,32], index: 12, kind: input, shape index: {}]   ;;  %s2864_s13 = inlined_call_operand.hbm [shape: f32[2,1,32], index: 13, kind: input, shape index: {}]   ;;  %s2865_s14 = inlined_call_operand.vmem [shape: bf16[2,32,128], index: 14, kind: input, shape index: {}]   ;;  %s2866_s15 = inlined_call_operand.vmem [shape: f32[2,1,128], index: 15, kind: input, shape index: {}]   ;;  %s2867_s16 = inlined_call_operand.vmem [shape: bf16[2,128,32], index: 16, kind: input, shape index: {}]   ;;  %s2868_s17 = inlined_call_operand.vmem [shape: f32[2,1,32], index: 17, kind: input, shape index: {}]   ;;  %s2869_s18 = inlined_call_operand.hbm [shape: f32[16,32], index: 18, kind: output, shape index: {}]  }
   0x1   :  { %2886 = sst [smem:[#allocation31_spill]] %s2851_s0 }
   0x2   :  { %2887 = sst [smem:[#allocation32_spill]] %s2852_s1 }
   0x3   :  { %2888 = sst [smem:[#allocation33_spill]] %s2853_s2 }
   0x4   :  { %2889 = sst [smem:[#allocation34_spill]] %s2854_s3 }
   0x5   :  { %2890 = sst [smem:[#allocation35_spill]] %s2855_s4 }
   0x6   :  { %2891 = sst [smem:[#allocation36_spill]] %s2857_s6 }
   0x7   :  { %2892 = sst [smem:[#allocation37_spill]] %s2858_s7 }
   0x8   :  { %2893 = sst [smem:[#allocation38_spill]] %s2859_s8 }
   0x9   :  { %2894 = sst [smem:[#allocation39_spill]] %s2860_s9 }
   0xa   :  { %2895 = sst [smem:[#allocation40_spill]] %s2861_s10 }
   0xb   :  { %2896 = sst [smem:[#allocation41_spill]] %s2862_s11 }
   0xc   :  { %2897 = sst [smem:[#allocation42_spill]] %s2863_s12 }
   0xd   :  { %2898 = sst [smem:[#allocation43_spill]] %s2864_s13 }
   0xe   :  { %2899 = sst [smem:[#allocation44_spill]] %s2865_s14 }
   0xf   :  { %2900 = sst [smem:[#allocation45_spill]] %s2866_s15 }
  0x10   :  { %2901 = sst [smem:[#allocation46_spill]] %s2867_s16 }
  0x11   :  { %2902 = sst [smem:[#allocation47_spill]] %s2868_s17 }
  0x12   :  { %2903 = sst [smem:[#allocation48_spill]] %s2869_s18 }
  0x13   :  { %23 = vsyncpa [#allocation4], 0 }
  0x14   :  { %25 = vsyncpa [#allocation4 + $0x1], 0 }
  0x15   :  { %26 = vsyncpa [#allocation7], 0 }
  0x16   :  { %27 = vsyncpa [#allocation5], 0 }
  0x17   :  { %29 = vsyncpa [#allocation5 + $0x1], 0  ;;  %s2412_s27 = smov 0   ;;  %s2414_s28 = smov 0  }
  0x18   :  { %s2416_s29 = smov 0   ;;  %s2418_s30 = smov 0  }
  0x19   :  { %s2420_s0 = smov 0   ;;  %s2422_s19 = smov 0  }
  0x1a   :  { %s2424_s1 = smov 0   ;;  %s2426_s20 = smov 0  }
  0x1b   :  { %s2428_s21 = smov 0   ;;  %s2430_s22 = smov 0  }
  0x1c   :  { %s2432_s2 = smov 0  }
  0x1d LB: > { %2904 = sst [smem:[#allocation16_spill]] %s2274_s28  ;;  %s1734_s23 = sadd.s32 4294967294, %s2310_s2   ;;  %s2310_s2 = sphi %s2432_s2, %s35_s2   ;;  %s2306_s22 = sphi %s2430_s22, %s2973_s22   ;;  %s2302_s21 = sphi %s2428_s21, %s2972_s21   ;;  %s2298_s20 = sphi %s2426_s20, %s2971_s20   ;;  %s2294_s1 = sphi %s2424_s1, %s2970_s1   ;;  %s2290_s19 = sphi %s2422_s19, %s2969_s19   ;;  %s2286_s0 = sphi %s2420_s0, %s2968_s0   ;;  %s2282_s30 = sphi %s2418_s30, %s2967_s30   ;;  %s2278_s29 = sphi %s2416_s29, %s2966_s29   ;;  %s2274_s28 = sphi %s2414_s28, %s2965_s28   ;;  %s2270_s27 = sphi %s2412_s27, %s2964_s27  }
  0x1e   : > { %2905 = sst [smem:[#allocation17_spill]] %s2278_s29  ;;  %s44_s24 = sadd.s32 1, %s2302_s21 }
  0x1f   : > { %2906 = sst [smem:[#allocation18_spill]] %s2282_s30  ;;  %p45_p0 = scmp.ge.s32.totalorder %s44_s24, 2 }
  0x20   : > { %2907 = sst [smem:[#allocation19_spill]] %s2286_s0  ;;  %s47_s25 = sadd.s32 1, %s2306_s22 }
  0x21   : > { %2908 = sst [smem:[#allocation20_spill]] %s2290_s19  ;;  %s54_s26 = sadd.s32 1, %s2290_s19 }
  0x22   : > { %2909 = sst [smem:[#allocation21_spill]] %s2298_s20  ;;  %p61_p1 = scmp.ne.s32.totalorder %s2290_s19, %s2286_s0 }
  0x23   : > { %2910 = sst [smem:[#allocation22_spill]] %s2302_s21  ;;  %s2975_s24 = smov (%p45_p0, %s44_s24), 0 }
  0x24   : > { %2911 = sst [smem:[#allocation23_spill]] %s2306_s22  ;;  %s2977_s25 = smov (!%p45_p0, %s47_s25), %s2306_s22 }
  0x25   : > { %2912 = sst [smem:[#allocation24_spill]] %s2310_s2  ;;  %p62_p2 = scmp.eq.s32.totalorder %s2310_s2, 0 }
  0x26   : > { %2913 = sst [smem:[#allocation25_spill]] %s2975_s24  ;;  %p67_p3 = scmp.ne.s32.totalorder %s2286_s0, %s2282_s30 }
  0x27   : > { %p49_p4 = scmp.ge.s32.totalorder %s2977_s25, 2  ;;  %s124_s18 = ssub.s32 %s2302_s21, %s2975_s24 }
  0x28   : > { %p2484_p5 = por %p62_p2, %p61_p1  ;;  %p125_p6 = scmp.eq.s32.totalorder %s124_s18, 0 }
  0x29   : > { %s2979_s25 = smov (%p49_p4, %s2977_s25), 0  ;;  %s127_s16 = sadd.s32 1, %s2278_s29 }
  0x2a   : > { %2915 = sst [smem:[#allocation26_spill]] %s2979_s25  ;;  %p134_p7 = scmp.ne.s32.totalorder %s2278_s29, %s2274_s28 }
  0x2b   : > { %s51_s17 = ssub.s32 %s2306_s22, %s2979_s25  ;;  %p534_p8 = scmp.eq.s32.totalorder %s1734_s23, 3 }
  0x2c   : > { %p52_p9 = scmp.eq.s32.totalorder %s51_s17, 0  ;;  %p2495_p10 = por %p134_p7, %p62_p2 }
  0x2d   : > { %s2500_s24 = scalar_select %p125_p6, %s2278_s29, %s127_s16  }
  0x2e   : > { %s2503_s14 = scalar_select %p52_p9, %s2290_s19, %s54_s26  }
  0x2f   : > { %2917 = sst [smem:[#allocation27_spill]] %s2500_s24  ;;  %p2508_p11 = por %p534_p8, %p67_p3 }
  0x30   : > { %2918 = sst [smem:[#allocation28_spill]] %s2503_s14  ;;  %p1902_p12 = scmp.lt.s32.totalorder %s2310_s2, 4 }
  0x31   : > { %s2919_s18 = scalar_select %p2508_p11, 1, 0 }
  0x32   : > { %s566_s23 = sand.u32 1, %s2310_s2   ;;  %s568_s17 = sand.u32 1, %s2290_s19  }
  0x33   : > { %2920 = sst [smem:[#allocation29_spill]] %s2919_s18  ;;  %s1738_s25 = sshll.u32 %s568_s17, 3 }
  0x34   : > { %s1739_s12 = sshll.u32 %s2306_s22, 3  ;;  %s2921_s8 = sld [smem:[#allocation31_spill]] }
  0x35   : > { %s570_s24 = scalar_lea.vmem [#allocation3], %s1738_s25  ;;  %p1885_p13 = pnand %p1902_p12, %p2484_p5 }
  0x36   : > { %s578_s26 = sshll.u32 %s570_s24, 4  ;;  %p2523_p0 = pnand %p1902_p12, %p2495_p10  ;;  %s579_s26 = int_to_ptr.vmem [resolvable:$true] %s578_s26 }
  0x37   : > { %s2528_s17 = sand.u32 1, %s2278_s29   ;;  %s2923_s3 = sld [smem:[#allocation34_spill]] }
  0x38   : > { %s596_s10 = scalar_lea.vmem [#allocation8], %s2528_s17  ;;  %s2924_s11 = sld [smem:[#allocation41_spill]] }
  0x39   : > { %s661_s24 = scalar_lea.vmem [#allocation9], %s2528_s17  ;;  %p140_p4 = scmp.ne.s32.totalorder %s2274_s28, %s2270_s27 }
  0x3a   : > { %s574_s7 = scalar_lea.hbm %s2921_s8, %s1739_s12  ;;  %s2534_s8 = scalar_lea.sflag [#allocation4], %s566_s23 }
  0x3b   : > { %s576_s16 = sshll.u32 %s574_s7, 4  ;;  %s603_s12 = sshll.u32 %s596_s10, 4  ;;  %s577_s16 = int_to_ptr.hbm [resolvable:$true] %s576_s16  ;;  %s604_s12 = int_to_ptr.vmem [resolvable:$true] %s603_s12 }
  0x3c   : > { %1887 = dma.hbm_to_vmem [thread:$0]  (!%p1885_p13), %s577_s16, 128, %s579_s26, %s2534_s8  }
  0x3d   : > { %s599_s7 = scalar_lea.hbm %s2923_s3, %s2302_s21  ;;  %s668_s25 = sshll.u32 %s661_s24, 4  ;;  %s669_s25 = int_to_ptr.vmem [resolvable:$true] %s668_s25 }
  0x3e   : > { %s601_s9 = sshll.u32 %s599_s7, 4  ;;  %s664_s22 = scalar_lea.hbm %s2924_s11, %s2302_s21  ;;  %s602_s9 = int_to_ptr.hbm [resolvable:$true] %s601_s9 }
  0x3f   : > { %1890 = dma.hbm_to_vmem [thread:$0]  (!%p2523_p0), %s602_s9, 16, %s604_s12, %s2534_s8  }
  0x40   : > { %s666_s18 = sshll.u32 %s664_s22, 4  ;;  %s2550_s23 = sadd.s32 4294967295, %s2310_s2   ;;  %s667_s18 = int_to_ptr.hbm [resolvable:$true] %s666_s18 }
  0x41   : > { %1893 = dma.hbm_to_vmem [thread:$0]  (!%p2523_p0), %s667_s18, 16, %s669_s25, %s2534_s8  }
  0x42   : > { %p68_p2 = scmp.eq.s32.totalorder %s2550_s23, 0  ;;  %p528_p5 = scmp.eq.s32.totalorder %s2550_s23, 3 }
  0x43   : > { %p1735_p6 = scmp.ge.s32.totalorder %s2310_s2, 1  ;;  %p541_p10 = scmp.lt.s32.totalorder %s2310_s2, 5 }
  0x44   : > { %p2562_p7 = por %p68_p2, %p67_p3  ;;  %p2568_p8 = por %p140_p4, %p68_p2 }
  0x45   : > { %p2575_p9 = por %p528_p5, %p61_p1  ;;  %s2929_s10 = sld [smem:[#allocation32_spill]] }
  0x46   : > { %p2583_p3 = pnand %p1735_p6, %p541_p10  ;;  %s2312_s20 = smov [#allocation6]  }
  0x47   : > { %s2927_s7 = scalar_select %p2575_p9, 1, 0 }
  0x48   : > { %p1880_p12 = pneg %p2583_p3  ;;  %s555_s22 = sshll.u32 %s2312_s20, 4  ;;  %s556_s22 = int_to_ptr.vmem [resolvable:$true] %s555_s22 }
  0x49   : > { %2928 = sst [smem:[#allocation30_spill]] %s2927_s7  ;;  %s684_s9 = scalar_lea.vmem [#allocation10], %s2528_s17 }
  0x4a   : > { %s2931_s13 = sld [smem:[#allocation43_spill]]  ;;  %p1881_p1 = pnand %p1880_p12, %p68_p2 }
  0x4b   : > { %s553_s12 = sshll.u32 %s2929_s10, 4  ;;  %s691_s10 = sshll.u32 %s684_s9, 4  ;;  %s554_s12 = int_to_ptr.hbm [resolvable:$true] %s553_s12  ;;  %s692_s10 = int_to_ptr.vmem [resolvable:$true] %s691_s10 }
  0x4c   : > { %1883 = dma.hbm_to_vmem [thread:$0]  (!%p1881_p1), %s554_s12, 128, %s556_s22, [#allocation7]  }
  0x4d   : > { %s730_s20 = sand.u32 (!%p2583_p3), 1, %s2550_s23   ;;  %s2875_s24 = sand.u32 (!%p2583_p3), 1, %s2286_s0  }
  0x4e   : > { %728 = sbr.rel (%p2583_p3) target bundleno = 1996 (0x7cc), region = 92  ;;  %s2605_s25 = sshll.u32 (!%p2583_p3), %s2875_s24, 3 }
  0x50   : > { %s687_s18 = scalar_lea.hbm %s2931_s13, %s2302_s21 }
  0x51   : > { %s689_s27 = sshll.u32 %s687_s18, 4  ;;  %s731_s18 = scalar_lea.sflag (!%p2583_p3), [#allocation4], %s730_s20  ;;  %s690_s27 = int_to_ptr.hbm [resolvable:$true] %s689_s27 }
  0x52   : > { %1896 = dma.hbm_to_vmem [thread:$0]  (!%p2523_p0), %s690_s27, 16, %s692_s10, %s2534_s8  }
  0x53   : > { %2253 = dma.done.wait (%p2562_p7), %s731_s18, 128  }
  0x54   : > { %2255 = vsyncadd (%p2562_p7), %s731_s18, 4294967168 }
  0x55   : > { %2257 = dma.done.wait (%p68_p2), [#allocation7], 128  }
  0x56   : > { %2259 = vsyncadd (%p68_p2), [#allocation7], 4294967168  ;;  %s2617_s14 = sand.u32 1, %s2274_s28  }
  0x57   : > { %2261 = dma.done.wait (%p2568_p8), %s731_s18, 48  }
  0x58   : > { %2263 = vsyncadd (%p2568_p8), %s731_s18, 4294967248  ;;  %p883_p13 = scmp.lt.s32.totalorder %s2294_s1, 1  ;;  %s2932_s9 = sld [smem:[#allocation33_spill]] }
  0x59   : > { %s2933_s4 = sld [smem:[#allocation35_spill]]  ;;  %s766_s17 = scalar_lea.vmem [#allocation10], %s2617_s14 }
  0x5a   : > { %s2626_s16 = scalar_select %p883_p13, %s2294_s1, 1 }
  0x5b   : > { %s2934_s6 = sld [smem:[#allocation36_spill]]  ;;  %s2691_s8 = scalar_lea.vmem [#allocation11], %s2605_s25 }
  0x5c   : > { %s1842_s23 = sshll.u32 %s2626_s16, 4  ;;  %s2936_s22 = sld [smem:[#allocation38_spill]] }
  0x5d   : > { %s2940_s12 = sld [smem:[#allocation44_spill]]  ;;  %s1847_s0 = sshll.u32 %s2626_s16, 6 }
  0x5e   : > { %s2636_s10 = scalar_lea.vmem %s2932_s9, %s1842_s23  ;;  %s2942_s9 = sld [smem:[#allocation47_spill]] }
  0x5f   : > { %s2641_s24 = scalar_lea.vmem %s2933_s4, %s1842_s23  ;;  %s2943_s18 = sld [smem:[#allocation46_spill]] }
  0x60   : > { %p1756_p0 = scmp.ne.s32.totalorder %s2294_s1, 0 }
  0x61   : > { %s2646_s3 = scalar_lea.vmem %s2934_s6, %s1842_s23  ;;  %s2939_s6 = sld [smem:[#allocation42_spill]] }
  0x62   : > { %s2655_s27 = scalar_lea.vmem %s2936_s22, %s1842_s23  ;;  %s2941_s22 = sld [smem:[#allocation45_spill]] }
  0x63   : > { %s2672_s15 = scalar_lea.vmem %s2940_s12, %s1842_s23  ;;  %s2944_s7 = scalar_lea.vmem (!%p1756_p0), [#allocation3], %s2605_s25 }
  0x64   : > { %s933_s20 = scalar_lea.vmem %s2942_s9, %s2626_s16  ;;  %938 = sbr.rel (%p1756_p0) target bundleno = 114 (0x72), region = 116 }
  0x65   : > { %s2686_s30 = scalar_lea.vmem %s2943_s18, %s1847_s0 }
  0x67   : > { %s917_s2 = scalar_lea.vmem %s2939_s6, %s2626_s16  ;;  %s757_s6 = scalar_lea.vmem [#allocation9], %s2617_s14 }
  0x68   : > { %s925_s26 = scalar_lea.vmem %s2941_s22, %s2626_s16 }
  0x69   : > { %v939_v0 = vld [vmem:[#allocation6] sm:$0xff]  ;;  %v940_v1 = vld [vmem:[%s2944_s7] sm:$0xff]  ;;  %v942_v2 = vlaneseq  ;;  %vm960_vm0 = vcmask 261120  }
  0x6a   : > { %v941_v4 = vadd.f32 %v940_v1, %v939_v0 }
  0x6b   : > { %v943_v3 = vshrl.u32 %v942_v2, 7 }
  0x6d   : > { %v948_v5 = vand.u32 7, %v943_v3 }
  0x6f   : > { %vm956_vm1 = vcmp.eq.s32.totalorder %v948_v5, 7 }
  0x70   : > { %v959_v6 = vsel %vm956_vm1, 0.0, %v941_v4 }
  0x71   : > { %961 = vst.msk [vmem:[%s2691_s8] sm:$0xff] %vm960_vm0, %v959_v6 }
  0x72 PF: > { %vm1009_vm2 = vcmask 261120   ;;  %v2313_v9 = vmov 32.0   ;;  %v2314_v21 = vmov 31.0   ;;  %v1849_v22 = vld [vmem:[%s2636_s10 + $0x8] sm:$0xff]  ;;  %v1848_v25 = vld [vmem:[%s2636_s10] sm:$0xff]  ;;  %s2947_s10 = scalar_lea.vmem %s2856_s5, %s2626_s16  ;;  %s2948_s11 = scalar_lea.vmem [#allocation8], %s2617_s14 }
  0x73   : > { %2008 = vrcp.f32 %v2313_v9  ;;  %v1851_v23 = vld [vmem:[%s2641_s24 + $0x8] sm:$0xff]  ;;  %1082 = vmatpush.bf16.msra.mxu0 %v1849_v22  ;;  %v1850_v26 = vld [vmem:[%s2641_s24] sm:$0xff]  ;;  %vm1149_vm7 = vcmask 130048   ;;  %s2315_s12 = smov 112   ;;  %s2949_s22 = sld [smem:[#allocation37_spill]]  ;;  %vm1185_vm8 = vcmask 1043456  }
  0x74   : > { %2010 = vrcp.f32 %v2314_v21  ;;  %1111 = vmatpush.bf16.msra.mxu2 %v1851_v23  ;;  %v1853_v34 = vld [vmem:[%s2646_s3 + $0x8] sm:$0xff]  ;;  %v1852_v36 = vld [vmem:[%s2646_s3] sm:$0xff]  ;;  %s2945_s3 = sld [smem:[#allocation40_spill]]  ;;  %vm1169_vm9 = vcmask 64512   ;;  %s2316_s29 = smov 16   ;;  %vm1266_vm10 = vcmask 261248  }
  0x75   : > { %v1999_v49 = vld [vmem:[%s757_s6] ss:$0 sm:$0xff]  ;;  %s2951_s28 = sld [smem:[#allocation39_spill]] }
  0x76   : > { %v2001_v55 = vld [vmem:[%s2947_s10] ss:$0 sm:$0xff]  ;;  %s2955_s7 = sld [smem:[#allocation21_spill]] }
  0x77   : > { %1083 = vmatpush.bf16.msra.mxu0 %v1848_v25  ;;  %v2000_v56 = vld [vmem:[%s2948_s11] ss:$0 sm:$0xff]  ;;  %s2959_s10 = sld [smem:[#allocation48_spill]] }
  0x78   : > { %v2698_v7 = vld [vmem:[%s2691_s8] sm:$0xff]  ;;  %1112 = vmatpush.bf16.msra.mxu2 %v1850_v26 }
  0x79   : > { %v1010_v8 = vsel %vm1009_vm2, %v2698_v7, 0.0  ;;  %v2009_v10 = vpop.eup %2008  ;;  %s2950_s19 = scalar_lea.vmem %s2949_s22, %s2626_s16 }
  0x7a   : > { %1011 = vadd.xlane.f32.xlu0 %v1010_v8  ;;  %v1014_v11 = vmul.f32 32.0, %v2009_v10  ;;  %vm1018_vm3 = vweird.f32 %v2009_v10  ;;  %v2011_v24 = vpop.eup %2010  ;;  %s2946_s24 = scalar_lea.vmem %s2945_s3, %s2626_s16  ;;  %v2002_v2 = vld [vmem:[%s2950_s19] ss:$0 sm:$0xff] }
  0x7b   : > { %v1027_v27 = vmul.f32 31.0, %v2011_v24  ;;  %vm1031_vm4 = vweird.f32 %v2011_v24  ;;  %v1998_v47 = vld [vmem:[%s2946_s24] ss:$0 sm:$0xff]  ;;  %s2952_s18 = scalar_lea.vmem %s2951_s28, %s2626_s16 }
  0x7c   : > { %v1015_v12 = vsub.f32 1.0, %v1014_v11  ;;  %1139 = vmatpush.bf16.msrb.mxu2 %v1853_v34 }
  0x7d   : > { %v1028_v28 = vsub.f32 1.0, %v1027_v27  ;;  %s2200_s9 = scalar_lea.hbm %s2959_s10, 16 }
  0x7e   : > { %v1016_v13 = vmul.f32 %v2009_v10, %v1015_v12 }
  0x7f   : > { %v1029_v29 = vmul.f32 %v2011_v24, %v1028_v28 }
  0x80   : > { %v1017_v14 = vadd.f32 %v2009_v10, %v1016_v13  ;;  %1140 = vmatpush.bf16.msrb.mxu2 %v1852_v36 }
  0x81   : > { %v1030_v30 = vadd.f32 %v2011_v24, %v1029_v29 }
  0x82   : > { %v2702_v15 = vsel %vm1018_vm3, %v2009_v10, %v1017_v14 }
  0x83   : > { %v2711_v31 = vsel %vm1031_vm4, %v2011_v24, %v1030_v30 }
  0xed   : > { %v1012_v16 = vpop.xlane.xlu0 %1011 }
  0xee   : > { %v1020_v17 = vmul.f32 %v2702_v15, %v1012_v16 }
  0xf0   : > { %v1021_v18 = vsub.f32 %v2698_v7, %v1020_v17 }
  0xf2   : > { %v1022_v19 = vmul.f32 %v1021_v18, %v1021_v18  ;;  %v1051_v48 = vmul.f32 %v1998_v47, %v1021_v18 }
  0xf4   : > { %v1023_v20 = vsel %vm1009_vm2, %v1022_v19, 0.0 }
  0xf5   : > { %1024 = vadd.xlane.f32.xlu0 %v1023_v20 }
 0x168   : > { %v1025_v32 = vpop.xlane.xlu0 %1024 }
 0x169   : > { %v1033_v33 = vmul.f32 %v2711_v31, %v1025_v32 }
 0x16b   : > { %2012 = vrsqrt.f32 %v1033_v33  ;;  %vm1041_vm5 = vcmp.eq.f32.partialorder %v1033_v33, inf  ;;  %v1044_v43 = vand.u32 2147483648, %v1033_v33  ;;  %vm1043_vm6 = vcmp.eq.f32.partialorder %v1033_v33, 0.0 }
 0x171   : > { %v2013_v35 = vpop.eup %2012 }
 0x172   : > { %v1035_v37 = vmul.f32 %v2013_v35, %v1033_v33 }
 0x174   : > { %v1036_v38 = vmul.f32 %v2013_v35, %v1035_v37 }
 0x176   : > { %v1037_v39 = vmul.f32 0.5, %v1036_v38 }
 0x178   : > { %v1038_v40 = vsub.f32 1.5, %v1037_v39 }
 0x17a   : > { %v1039_v41 = vmul.f32 %v2013_v35, %v1038_v40  ;;  %v1855_v40 = vld [vmem:[%s2655_s27 + $0x8] sm:$0xff] }
 0x17c   : > { %v1040_v42 = vmul.f32 %v1039_v41, %v1033_v33 }
 0x17e   : > { %v1042_v44 = vsel %vm1041_vm5, %v1033_v33, %v1040_v42 }
 0x17f   : > { %v1045_v45 = vsel %vm1043_vm6, %v1044_v43, %v1042_v44 }
 0x180   : > { %v1046_v46 = vadd.f32 1e-06, %v1045_v45  ;;  %v1854_v45 = vld [vmem:[%s2655_s27] sm:$0xff] }
 0x182   : > { %2014 = vrcp.f32 %v1046_v46 }
 0x188   : > { %v2015_v50 = vpop.eup %2014 }
 0x189   : > { %v1052_v51 = vmul.f32 %v2015_v50, %v1051_v48 }
 0x18b   : > { %v1056_v52 = vadd.f32 %v1999_v49, %v1052_v51  ;;  %v2003_v49 = vld [vmem:[%s2952_s18] ss:$0 sm:$0xff] }
 0x18d   : > { %v1057_v53 = vpack.c.bf16 %v1056_v52, %v1056_v52 }
 0x18f   : > { %1765 = vmatmul.msk.bf16.vlgmr.msra.gmra.mxu0 %vm1009_vm2, %v1057_v53  ;;  %1774 = vmatmul.msk.bf16.vlgmr.msra.gmra.mxu2 %vm1009_vm2, %v1057_v53 }
 0x19f   : > { %1783 = vmatmul.msk.bf16.vlgmr.msrb.gmra.mxu2 %vm1009_vm2, %v1057_v53 }
 0x20c   : > { %v1085_v54 = vpop.f32.mrf.mxu0 }
 0x20d   : > { %v1086_v60 = vadd.f32 %v2000_v56, %v1085_v54 }
 0x20f   : > { %v1089_v63 = vmul.f32 0.25, %v1086_v60  ;;  %v1857_v60 = vld [vmem:[%s2672_s15 + $0x8] sm:$0xff] }
 0x211   : > { %v1146_v1 = vpack.c.bf16 %v1089_v63, %v1089_v63  ;;  %v1865_v63 = vld [vmem:[%s2686_s30 + $0x38] sm:$0xff] }
 0x212   : > { %v1114_v57 = vpop.f32.mrf.mxu2 }
 0x213   : > { %v1115_v58 = vadd.f32 %v2001_v55, %v1114_v57 }
 0x214   : > { %v1087_v59 = vpop.f32.mrf.mxu0 }
 0x215   : > { %v1147_v61 = vpack.c.bf16 %v1115_v58, %v1115_v58 }
 0x217   : > { %1207 = vrot.lane.b32.xlu1 %v1147_v61, %s2315_s12  ;;  %v1154_v62 = vsel %vm1149_vm7, %v1147_v61, 0 }
 0x218   : > { %1163 = vmatpush.bf16.xpose.msra.mxu3 %v1154_v62 }
 0x21a   : > { %v1116_v0 = vpop.f32.mrf.mxu2 }
 0x21f   : > { %1204 = vrot.lane.b32.xlu1 %v1146_v1, %s2315_s12  ;;  %1784 = vmatmul.msk.bf16.vlgmr.msra.gmra.mxu3 %vm1149_vm7, %v1146_v1  ;;  %v1864_v1 = vld [vmem:[%s2686_s30 + $0x30] sm:$0xff] }
 0x220   : > { %1294 = vmatpush.bf16.msrb.mxu3 %v1855_v40  ;;  %v2007_v40 = vld [vmem:[%s933_s20] ss:$0 sm:$0xff] }
 0x222   : > { %v1142_v3 = vpop.f32.mrf.mxu2 }
 0x223   : > { %v1143_v4 = vadd.f32 %v2002_v2, %v1142_v3 }
 0x224   : > { %1295 = vmatpush.bf16.msrb.mxu3 %v1854_v45 }
 0x225   : > { %v1148_v5 = vpack.c.bf16 %v1143_v4, %v1143_v4 }
 0x227   : > { %1241 = vrot.lane.b32.xlu1 %v1148_v5, %s2315_s12  ;;  %v1187_v6 = vsel %vm1185_vm8, %v1148_v5, 0  ;;  %s1456_s12 = sshll.u32 %s2691_s8, 4  ;;  %s1457_s12 = int_to_ptr.vmem [resolvable:$true] %s1456_s12 }
 0x228   : > { %1196 = vmatpush.bf16.msrb.mxu0 %v1187_v6 }
 0x22a   : > { %v1144_v8 = vpop.f32.mrf.mxu2 }
 0x22c   : > { %1360 = vmatpush.bf16.msra.mxu0 %v1857_v60 }
 0x289   : > { %v1208_v9 = vpop.permute.xlu1 %1207 }
 0x28a   : > { %v1213_v10 = vsel %vm1149_vm7, %v1208_v9, 0 }
 0x28b   : > { %1222 = vmatpush.bf16.xpose.msra.mxu1 %v1213_v10 }
 0x291   : > { %v1205_v11 = vpop.permute.xlu1 %1204 }
 0x292   : > { %1786 = vmatmul.msk.bf16.vlgmr.msra.gmra.mxu1 %vm1149_vm7, %v1205_v11  ;;  %v2004_v11 = vld [vmem:[%s917_s2] ss:$0 sm:$0xff] }
 0x293   : > { %1428 = vmatpush.bf16.msrb.mxu1 %v1865_v63 }
 0x297   : > { %1429 = vmatpush.bf16.msrb.mxu1 %v1864_v1 }
 0x299   : > { %v1242_v12 = vpop.permute.xlu1 %1241 }
 0x29a   : > { %v1247_v13 = vsel %vm1185_vm8, %v1242_v12, 0 }
 0x29b   : > { %1256 = vmatpush.bf16.msra.mxu2 %v1247_v13  ;;  %v2005_v13 = vld [vmem:[%s766_s17] ss:$0 sm:$0xff] }
 0x2a2   : > { %v1165_v14 = vpop.f32.mrf.mxu3 }
 0x2a3   : > { %v1170_v20 = vsel %vm1169_vm9, %v1165_v14, -inf }
 0x2aa   : > { %v1167_v16 = vpop.f32.mrf.mxu3 }
 0x30f   : > { %v1224_v17 = vpop.f32.mrf.mxu1 }
 0x310   : > { %v1228_v18 = vsel %vm1169_vm9, %v1224_v17, -inf }
 0x311   : > { %1229 = vmax.xlane.f32.xlu2 %v1228_v18 }
 0x317   : > { %v1226_v19 = vpop.f32.mrf.mxu1 }
 0x318   : > { %v1863_v19 = vld [vmem:[%s2686_s30 + $0x28] sm:$0xff] }
 0x319   : > { %1171 = vmax.xlane.f32.xlu2 %v1170_v20  ;;  %1430 = vmatpush.bf16.msrb.mxu1 %v1863_v19  ;;  %v1862_v20 = vld [vmem:[%s2686_s30 + $0x20] sm:$0xff] }
 0x31d   : > { %1431 = vmatpush.bf16.msrb.mxu1 %v1862_v20 }
 0x384   : > { %v1230_v21 = vpop.xlane.xlu2 %1229 }
 0x385   : > { %v1231_v22 = vsub.f32 %v1224_v17, %v1230_v21  ;;  %v1861_v21 = vld [vmem:[%s2686_s30 + $0x18] sm:$0xff] }
 0x386   : > { %1432 = vmatpush.bf16.msrb.mxu1 %v1861_v21 }
 0x387   : > { %v1232_v23 = vmul.f32 1.442695, %v1231_v22  ;;  %v1860_v22 = vld [vmem:[%s2686_s30 + $0x10] sm:$0xff] }
 0x389   : > { %2016 = vpow2.f32 %v1232_v23  ;;  %v1859_v23 = vld [vmem:[%s2686_s30 + $0x8] sm:$0xff] }
 0x38a   : > { %1433 = vmatpush.bf16.msrb.mxu1 %v1860_v22 }
 0x38c   : > { %v1172_v24 = vpop.xlane.xlu2 %1171 }
 0x38d   : > { %v1173_v25 = vsub.f32 %v1165_v14, %v1172_v24  ;;  %v1858_v24 = vld [vmem:[%s2686_s30] sm:$0xff]  ;;  %s2956_s30 = sld [smem:[#allocation19_spill]] }
 0x38e   : > { %1434 = vmatpush.bf16.msrb.mxu1 %v1859_v23 }
 0x38f   : > { %v2017_v26 = vpop.eup %2016  ;;  %v1174_v27 = vmul.f32 1.442695, %v1173_v25  ;;  %v2006_v25 = vld [vmem:[%s925_s26] ss:$0 sm:$0xff]  ;;  %s1839_s26 = sshll.u32 %s2955_s7, 3 }
 0x390   : > { %v1234_v28 = vsel %vm1169_vm9, %v2017_v26, 0.0  ;;  %s1454_s11 = scalar_lea.hbm %s2959_s10, %s1839_s26 }
 0x391   : > { %2018 = vpow2.f32 %v1174_v27  ;;  %1235 = vadd.xlane.f32.xlu0 %v1234_v28  ;;  %s1458_s13 = sshll.u32 %s1454_s11, 4  ;;  %s1459_s13 = int_to_ptr.hbm [resolvable:$true] %s1458_s13 }
 0x392   : > { %1435 = vmatpush.bf16.msrb.mxu1 %v1858_v24  ;;  %s2194_s19 = sshra.s32 %s1459_s13, 4  ;;  %s2195_s19 = int_to_ptr.hbm [resolvable:$true] %s2194_s19 }
 0x393   : > { %s2960_s21 = sand.u32 1, %s2956_s30   ;;  %s2196_s16 = scalar_lea.hbm %s2195_s19, 8 }
 0x394   : > { %s1444_s22 = scalar_lea.sflag [#allocation5], %s2960_s21  ;;  %p2197_p2 = scmp.ne.s32.totalorder %s2195_s19, %s2196_s16 }
 0x395   : > { %p2201_p6 = scmp.lt.s32.totalorder %s2195_s19, %s2959_s10  ;;  %p2202_p7 = scmp.lt.s32.totalorder %s2200_s9, %s2196_s16 }
 0x396   : > { %p2198_p4 = pnand %p2197_p2, %p2575_p9 }
 0x397   : > { %v2019_v29 = vpop.eup %2018  ;;  %p2203_p8 = por %p2202_p7, %p2201_p6 }
 0x398   : > { %v1176_v30 = vsel %vm1169_vm9, %v2019_v29, 0.0  ;;  %p2199_p5 = pneg %p2198_p4 }
 0x399   : > { %1177 = vadd.xlane.f32.xlu2 %v1176_v30 }
 0x39a   : > { %p2204_p10 = pnand %p2203_p8, %p2199_p5 }
 0x404   : > { %v1236_v32 = vpop.xlane.xlu0 %1235 }
 0x405   : > { %2020 = vrcp.f32 %v1236_v32 }
 0x40b   : > { %v2021_v33 = vpop.eup %2020 }
 0x40c   : > { %v1238_v34 = vmul.f32 %v2021_v33, %v2017_v26  ;;  %v1178_v35 = vpop.xlane.xlu2 %1177 }
 0x40d   : > { %2022 = vrcp.f32 %v1178_v35 }
 0x40e   : > { %v1239_v36 = vpack.c.bf16 %v1238_v34, %v1238_v34 }
 0x410   : > { %1787 = vmatmul.msk.bf16.vlgmr.msra.gmra.mxu2 %vm1169_vm9, %v1239_v36 }
 0x413   : > { %v2023_v37 = vpop.eup %2022 }
 0x414   : > { %v1180_v38 = vmul.f32 %v2023_v37, %v2019_v29 }
 0x416   : > { %v1181_v39 = vpack.c.bf16 %v1180_v38, %v1180_v38 }
 0x418   : > { %1785 = vmatmul.msk.bf16.vlgmr.msrb.gmra.mxu0 %vm1169_vm9, %v1181_v39 }
 0x493   : > { %v1258_v41 = vpop.f32.mrf.mxu2 }
 0x494   : > { %1263 = vrot.lane.b32.xlu0 %v1258_v41, %s2316_s29 }
 0x495   : > { %v1198_v42 = vpop.f32.mrf.mxu0 }
 0x496   : > { %1202 = vst.msk [vmem:[#allocation2] sm:$0xff] %vm1149_vm7, %v1198_v42 }
 0x49b   : > { %v1260_v43 = vpop.f32.mrf.mxu2 }
 0x49d   : > { %v1200_v44 = vpop.f32.mrf.mxu0 }
 0x506   : > { %v1264_v46 = vpop.permute.xlu0 %1263 }
 0x507   : > { %1267 = vst.msk [vmem:[#allocation2] sm:$0xff] %vm1266_vm10, %v1264_v46 }
 0x50e   : > { %v1268_v47 = vld [vmem:[#allocation2] sm:$0xff] }
 0x50f   : > { %v1269_v48 = vpack.c.bf16 %v1268_v47, %v1268_v47 }
 0x511   : > { %1796 = vmatmul.msk.bf16.vlgmr.msrb.gmra.mxu3 %vm1009_vm2, %v1269_v48 }
 0x594   : > { %v1297_v50 = vpop.f32.mrf.mxu3 }
 0x595   : > { %v1298_v51 = vadd.f32 %v2003_v49, %v1297_v50 }
 0x597   : > { %v2758_v52 = vadd.f32 %v1298_v51, %v2698_v7  ;;  %v1856_v7 = vld [vmem:[%s2672_s15] sm:$0xff] }
 0x598   : > { %1361 = vmatpush.bf16.msra.mxu0 %v1856_v7 }
 0x599   : > { %v1302_v53 = vsel %vm1009_vm2, %v2758_v52, 0.0 }
 0x59a   : > { %1303 = vadd.xlane.f32.xlu1 %v1302_v53 }
 0x59c   : > { %v1299_v54 = vpop.f32.mrf.mxu3 }
 0x60d   : > { %v1304_v55 = vpop.xlane.xlu1 %1303 }
 0x60e   : > { %v1305_v56 = vmul.f32 %v1304_v55, %v2702_v15 }
 0x610   : > { %v1306_v57 = vsub.f32 %v2758_v52, %v1305_v56 }
 0x612   : > { %v1307_v58 = vmul.f32 %v1306_v57, %v1306_v57  ;;  %v1329_v12 = vmul.f32 %v2004_v11, %v1306_v57 }
 0x614   : > { %v1308_v59 = vsel %vm1009_vm2, %v1307_v58, 0.0 }
 0x615   : > { %1309 = vadd.xlane.f32.xlu2 %v1308_v59 }
 0x688   : > { %v1310_v61 = vpop.xlane.xlu2 %1309 }
 0x689   : > { %v1311_v62 = vmul.f32 %v1310_v61, %v2711_v31 }
 0x68b   : > { %2024 = vrsqrt.f32 %v1311_v62  ;;  %vm1319_vm11 = vcmp.eq.f32.partialorder %v1311_v62, inf  ;;  %v1322_v8 = vand.u32 2147483648, %v1311_v62  ;;  %vm1321_vm12 = vcmp.eq.f32.partialorder %v1311_v62, 0.0 }
 0x691   : > { %v2025_v0 = vpop.eup %2024 }
 0x692   : > { %v1313_v15 = vmul.f32 %v2025_v0, %v1311_v62 }
 0x694   : > { %v1314_v2 = vmul.f32 %v2025_v0, %v1313_v15 }
 0x696   : > { %v1315_v3 = vmul.f32 0.5, %v1314_v2 }
 0x698   : > { %v1316_v4 = vsub.f32 1.5, %v1315_v3 }
 0x69a   : > { %v1317_v5 = vmul.f32 %v2025_v0, %v1316_v4 }
 0x69c   : > { %v1318_v6 = vmul.f32 %v1317_v5, %v1311_v62 }
 0x69e   : > { %v1320_v9 = vsel %vm1319_vm11, %v1311_v62, %v1318_v6 }
 0x69f   : > { %v1323_v31 = vsel %vm1321_vm12, %v1322_v8, %v1320_v9 }
 0x6a0   : > { %v1324_v10 = vadd.f32 1e-06, %v1323_v31 }
 0x6a2   : > { %2026 = vrcp.f32 %v1324_v10 }
 0x6a8   : > { %v2027_v14 = vpop.eup %2026 }
 0x6a9   : > { %v1330_v16 = vmul.f32 %v2027_v14, %v1329_v12 }
 0x6ab   : > { %v1334_v17 = vadd.f32 %v2005_v13, %v1330_v16 }
 0x6ad   : > { %v1335_v18 = vpack.c.bf16 %v1334_v17, %v1334_v17 }
 0x6af   : > { %1805 = vmatmul.msk.bf16.vlgmr.msra.gmra.mxu0 %vm1009_vm2, %v1335_v18 }
 0x72c   : > { %v1363_v26 = vpop.f32.mrf.mxu0 }
 0x72d   : > { %v1364_v27 = vadd.f32 %v2006_v25, %v1363_v26 }
 0x72f   : > { %v1368_v28 = vmul.f32 0.044715, %v1364_v27  ;;  %v1367_v36 = vmul.f32 0.5, %v1364_v27 }
 0x731   : > { %v1369_v29 = vmul.f32 %v1368_v28, %v1364_v27 }
 0x733   : > { %v1370_v30 = vmul.f32 %v1369_v29, %v1364_v27 }
 0x734   : > { %v1365_v32 = vpop.f32.mrf.mxu0 }
 0x735   : > { %v1371_v33 = vadd.f32 %v1370_v30, %v1364_v27 }
 0x737   : > { %v1372_v34 = vmul.f32 0.7978846, %v1371_v33 }
 0x739   : > { %2028 = vtanh.f32 %v1372_v34 }
 0x73f   : > { %v2029_v35 = vpop.eup %2028 }
 0x740   : > { %v1374_v37 = vadd.f32 1.0, %v2029_v35 }
 0x742   : > { %v1375_v38 = vmul.f32 %v1374_v37, %v1367_v36 }
 0x744   : > { %v1376_v39 = vpack.c.bf16 %v1375_v38, %v1375_v38 }
 0x746   : > { %1436 = vmatmul.bf16.vlgmr.msrb.gmra.mxu1 %v1376_v39 }
 0x7c3   : > { %v1437_v41 = vpop.f32.mrf.mxu1 }
 0x7c4   : > { %v1438_v42 = vadd.f32 %v2007_v40, %v1437_v41 }
 0x7c6   : > { %v1441_v43 = vadd.f32 %v1438_v42, %v2758_v52 }
 0x7c8   : > { %1442 = vst.msk [vmem:[%s2691_s8] sm:$0xff] %vm1009_vm2, %v1441_v43 }
 0x7c9   : > { %2207 = shalt.err (!%p2204_p10)
}
 0x7ca   : > { %1878 = dma.vmem_to_hbm [thread:$0]  (%p2575_p9), %s1457_s12, 128, %s1459_s13, %s1444_s22  }
 0x7cb   : > { %v1439_v44 = vpop.f32.mrf.mxu1 }
 0x7cc PF: > { %s2961_s8 = sld [smem:[#allocation24_spill]] }
 0x7cd   : > { %s2962_s18 = sld [smem:[#allocation18_spill]] }
 0x7d2   : > { %p1904_p3 = scmp.ge.s32.totalorder %s2961_s8, 2 }
 0x7d3   : > { %s1470_s15 = sand.u32 1, %s2962_s18  }
 0x7d4   : > { %p1898_p12 = pnand %p1904_p3, %p2508_p11  ;;  %s1471_s6 = scalar_lea.sflag [#allocation5], %s1470_s15 }
 0x7d6   : > { %p1899_p1 = pneg %p1898_p12 }
 0x7d8   : > { %2265 = dma.done.wait (%p1899_p1), %s1471_s6, 128  }
 0x7d9   : > { %2267 = vsyncadd (%p1899_p1), %s1471_s6, 4294967168  ;;  %s35_s2 = sadd.s32 1, %s2961_s8   ;;  %s2964_s27 = sld [smem:[#allocation16_spill]] }
 0x7da   : > { %p32_p13 = scmp.ge.s32.totalorder %s35_s2, 6   ;;  %s2965_s28 = sld [smem:[#allocation17_spill]] }
 0x7db   : > { %s2966_s29 = sld [smem:[#allocation27_spill]] }
 0x7dc   : > { %s2967_s30 = sld [smem:[#allocation19_spill]] }
 0x7dd   : > { %s2968_s0 = sld [smem:[#allocation20_spill]] }
 0x7de   : > { %s2969_s19 = sld [smem:[#allocation28_spill]]  ;;  %34 = sbr.rel (!%p32_p13) target bundleno = 29 (0x1d), region = 217 }
 0x7df   : > { %s2970_s1 = sld [smem:[#allocation22_spill]] }
 0x7e0   : > { %s2971_s20 = sld [smem:[#allocation23_spill]] }
 0x7e1   : > { %s2972_s21 = sld [smem:[#allocation25_spill]] }
 0x7e2   : > { %s2973_s22 = sld [smem:[#allocation26_spill]] }
 0x7e3   :  { %1477 = vsyncpa [#allocation4], 1 }
 0x7e4   :  { %1479 = vsyncpa [#allocation4 + $0x1], 1 }
 0x7e5   :  { %1480 = vsyncpa [#allocation7], 1 }
 0x7e6   :  { %1481 = vsyncpa [#allocation5], 1 }
 0x7e7   :  { %1483 = vsyncpa [#allocation5 + $0x1], 1 }

</bundles_post_ra>
